<compile_context>
chip_gen: v6e
topology: v6e:2x2x1
jax: 0.10.0
libtpu: 0.0.40
codegen_flags: <defaults>
</compile_context>

<pallas_src>
import jax
import jax.numpy as jnp
from jax.experimental import pallas as pl
from jax.experimental.pallas import tpu as pltpu


# ------------------------------- Pallas kernel -------------------------------

def _upsample_kernel(src_ref, x_ref, o_ref):
    # src_ref: (1, TWo)  int32  -- low-res source column for each output column
    # x_ref:   (TM, Kd)         -- low-res rows (planes/rows folded into row+lane dims)
    # o_ref:   (TM, TWo)        -- upsampled output tile (lane-dense)
    Kd = x_ref.shape[1]
    TWo = o_ref.shape[1]

    # One-hot lane-replication slab generated in-kernel (VPU filler, hidden under the
    # HBM write stream; nothing in HBM, nothing double-buffered).
    k_ids = jax.lax.broadcasted_iota(jnp.int32, (Kd, TWo), 0)
    sel = jnp.where(k_ids == src_ref[...], 1.0, 0.0).astype(x_ref.dtype)

    # Pure selection matmul: every output element is exactly one copied input value.
    o_ref[...] = jnp.dot(
        x_ref[...], sel, preferred_element_type=jnp.float32
    ).astype(o_ref.dtype)


# ------------------------------- tiling helpers -------------------------------

def _pick_tile(total, target, align):
    """Largest divisor of `total` that is <= target and aligned, else `total`.

    A block equal to the full array extent always satisfies the TPU (8,128) rule.
    """
    if total <= target:
        return total
    for d in range(min(target, total), 0, -1):
        if total % d == 0 and d % align == 0:
            return d
    return total


def _choose_fold(M, OW, Wl, max_contract=512, lane=128, min_lanes=512):
    """Fold k low-res rows into one output row so the output last dim is a
    multiple of 128 lanes (unmasked vst's).  Keeps the selection/contraction
    dim (k*Wl) small so the kernel stays memory-bound, not MXU-bound."""
    if OW % lane == 0 and OW >= min_lanes:
        return 1
    for k in range(1, M + 1):
        if k * Wl > max_contract:
            break
        if M % k != 0:
            continue
        if (k * OW) % lane == 0:
            return k
    return 1


# --------------------------------- wrapper ------------------------------------

def nearest_upsample_pallas(learned, scale_factor):
    """Nearest-neighbor upsample of an NCHW tensor by `scale_factor` (Pallas TPU)."""
    N, C, Hl, Wl = learned.shape
    s = int(scale_factor)
    H, W = Hl * s, Wl * s

    M = N * C * Hl          # all planes' low-res rows folded into one row dim
    OW = s * W              # output columns produced by one low-res row (= s*s*Wl)

    # Optional extra row-fold for lane-dense output stores (free reshapes).
    k = _choose_fold(M, OW, Wl)
    Mf, OWf, Kd = M // k, k * OW, k * Wl

    x2 = learned.reshape(Mf, Kd)

    # Tiny int32 map: folded output column -> folded low-res source column.
    c = jnp.arange(OWf, dtype=jnp.int32)
    src = ((c // OW) * Wl + (c % W) // s).reshape(1, OWf)

    # Tiles: rows up to 512 (mult. of 8), output cols up to 2048 (mult. of 128)
    # -> <= 4 MiB output block; double-buffered totals stay well under 32 MiB VMEM.
    TM = _pick_tile(Mf, target=512, align=8)
    TWo = _pick_tile(OWf, target=2048, align=128)
    grid = (Mf // TM, OWf // TWo)   # columns innermost -> input block stays resident

    itemsize = jnp.dtype(learned.dtype).itemsize
    cost = pl.CostEstimate(
        flops=int(2 * Mf * OWf * Kd),              # one-hot selection matmul
        transcendentals=0,
        bytes_accessed=int((M * Wl + M * OW) * itemsize + OWf * 4),
    )

    out = pl.pallas_call(
        _upsample_kernel,
        out_shape=jax.ShapeDtypeStruct((Mf, OWf), learned.dtype),
        grid=grid,
        in_specs=[
            pl.BlockSpec((1, TWo), lambda i, j: (0, j)),   # column-source map (tiny)
            pl.BlockSpec((TM, Kd), lambda i, j: (i, 0)),   # low-res rows (resident over j)
        ],
        out_specs=pl.BlockSpec((TM, TWo), lambda i, j: (i, j)),
        compiler_params=pltpu.CompilerParams(
            dimension_semantics=("parallel", "parallel"),
            vmem_limit_bytes=32 * 1024 * 1024,
        ),
        cost_estimate=cost,
    )(src, x2)

    # Free row-major reshape back to NCHW (this *is* the row replication).
    return out.reshape(N, C, H, W)


# ----------------------------- Module equivalent ------------------------------

class LowResMetamerImage:
    """JAX/Pallas equivalent of the PyTorch LowResMetamerImage module (forward path)."""

    def __init__(self, seed_image, scale_factor=2):
        if seed_image.ndim == 3:
            seed_image = seed_image[None]
        s = int(scale_factor)
        N, C, H, W = seed_image.shape
        assert H % s == 0 and W % s == 0
        # avg_pool2d(kernel=stride=scale_factor): parameter initialization (glue, not hot path).
        pooled = seed_image.reshape(N, C, H // s, s, W // s, s).mean(axis=(3, 5))
        self.learned = pooled           # the "parameter"
        self.scale_factor = s
        # TODO(synk): optimizer-side utilities of MetamerImage (grad clamping, pixel
        # freezing, loss bookkeeping) are host/training glue, not part of forward().

    def get_lowres_image(self):
        return self.learned

    def forward(self):
        # Hot path: nearest-neighbor interpolation, executed in the Pallas kernel.
        return nearest_upsample_pallas(self.learned, self.scale_factor)

    __call__ = forward


# ------------------------------------ main ------------------------------------

if __name__ == "__main__":
    key = jax.random.PRNGKey(0)
    # Small shapes consistent with the module: NCHW seed image.
    N, C, H, W = 2, 4, 16, 16
    scale_factor = 2
    seed_image = jax.random.uniform(key, (N, C, H, W), dtype=jnp.float32)

    model = LowResMetamerImage(seed_image, scale_factor=scale_factor)
    out = jax.block_until_ready(model())

    # Reference: pure-JAX nearest upsample of the learned (pooled) parameter.
    ref = jnp.repeat(jnp.repeat(model.learned, scale_factor, axis=2),
                     scale_factor, axis=3)

    assert out.shape == (N, C, H, W), out.shape
    assert out.dtype == seed_image.dtype
    assert jnp.array_equal(out, ref), "mismatch vs reference"

    print("KERNEL_OK")
</pallas_src>

<mosaic_0001>
module attributes {stable_mosaic.version = 11 : i64} {
  func.func @_upsample_kernel(%arg0: i32, %arg1: i32, %arg2: memref<1x128xi32, #tpu.memory_space<vmem>>, %arg3: memref<16x32xf32, #tpu.memory_space<vmem>>, %arg4: memref<16x128xf32, #tpu.memory_space<vmem>>) attributes {dimension_semantics = [#tpu.dimension_semantics<parallel>, #tpu.dimension_semantics<parallel>], iteration_bounds = array<i64: 1, 1>, scalar_prefetch = 0 : i64, scratch_operands = 0 : i64, tpu.core_type = #tpu.core_type<tc>, window_params = [{transform_indices = @transform_0, window_bounds = array<i64: 1, 128>}, {transform_indices = @transform_1, window_bounds = array<i64: 16, 32>}, {transform_indices = @transform_2, window_bounds = array<i64: 16, 128>}]} {
    %0 = tpu.iota {dimensions = array<i32: 0>} : vector<32x128xi32>
    %c0 = arith.constant 0 : index
    %c0_0 = arith.constant 0 : index
    %1 = vector.load %arg2[%c0, %c0_0] : memref<1x128xi32, #tpu.memory_space<vmem>>, vector<1x128xi32>
    %2 = vector.broadcast %1 : vector<1x128xi32> to vector<32x128xi32>
    %3 = arith.cmpi eq, %0, %2 : vector<32x128xi32>
    %cst = arith.constant 1.000000e+00 : f32
    %cst_1 = arith.constant 0.000000e+00 : f32
    %4 = vector.broadcast %cst : f32 to vector<32x128xf32>
    %5 = vector.broadcast %cst_1 : f32 to vector<32x128xf32>
    %6 = arith.select %3, %4, %5 : vector<32x128xi1>, vector<32x128xf32>
    %c0_2 = arith.constant 0 : index
    %c0_3 = arith.constant 0 : index
    %7 = vector.load %arg3[%c0_2, %c0_3] : memref<16x32xf32, #tpu.memory_space<vmem>>, vector<16x32xf32>
    %cst_4 = arith.constant dense<0.000000e+00> : vector<16x128xf32>
    %8 = tpu.matmul %7, %6, %cst_4 {dimension_numbers = #tpu.dot_dimension_numbers<[1], [0], [0], [1], [0, 0, 1, 1], [], []>} : vector<16x32xf32>, vector<32x128xf32>, vector<16x128xf32> -> vector<16x128xf32>
    %c0_5 = arith.constant 0 : index
    %c0_6 = arith.constant 0 : index
    %9 = vector.load %arg4[%c0_5, %c0_6] : memref<16x128xf32, #tpu.memory_space<vmem>>, vector<16x128xf32>
    tpu.vector_store %arg4[%c0_5, %c0_6], %8 {strides = array<i32>} : memref<16x128xf32, #tpu.memory_space<vmem>>, vector<16x128xf32>,
    return
  }
  func.func @transform_0(%arg0: i32, %arg1: i32) -> (i32, i32) {
    %c0_i32 = arith.constant 0 : i32
    %c0_i32_0 = arith.constant 0 : i32
    return %c0_i32, %arg1 : i32, i32
  }
  func.func @transform_1(%arg0: i32, %arg1: i32) -> (i32, i32) {
    %c0_i32 = arith.constant 0 : i32
    %c0_i32_0 = arith.constant 0 : i32
    return %arg0, %c0_i32 : i32, i32
  }
  func.func @transform_2(%arg0: i32, %arg1: i32) -> (i32, i32) {
    %c0_i32 = arith.constant 0 : i32
    return %arg0, %arg1 : i32, i32
  }
}

</mosaic_0001>

<bundles_post_ra>
// kernel: tpu_custom_call.1
= control target key start
LH: loop header
LB: loop body
LE: loop exit
PB: predicated region body
PF: predicated region fallthrough
CT: control target
= control target key end

     0   :  { %7 = vsyncpa [#allocation3], 0  ;;  %s294_s0 = inlined_call_operand.hbm [shape: s32[1,128], index: 0, kind: input, shape index: {}]   ;;  %s295_s1 = inlined_call_operand.hbm [shape: f32[16,32], index: 1, kind: input, shape index: {}]   ;;  %s296_s2 = inlined_call_operand.hbm [shape: f32[16,128], index: 2, kind: output, shape index: {}]  }
   0x1   :  { %8 = vsyncpa [#allocation6], 0 }
   0x2   :  { %9 = vsyncpa [#allocation4], 0  ;;  %s256_s9 = smov [#allocation2]   ;;  %s257_s11 = smov [#allocation5]  }
   0x3   :  { %s16_s10 = sshll.u32 %s256_s9, 4  ;;  %s25_s12 = sshll.u32 %s257_s11, 4  ;;  %s17_s10 = int_to_ptr.vmem [resolvable:$true] %s16_s10  ;;  %s26_s12 = int_to_ptr.vmem [resolvable:$true] %s25_s12 }
   0x4   :  { %s198_s13 = scalar_lea.vmem %s17_s10, 16  ;;  %s202_s14 = scalar_lea.vmem %s17_s10, 32 }
   0x5   :  { %p199_p0 = scmp.ne.s32.totalorder %s17_s10, %s198_s13  ;;  %p203_p1 = scmp.lt.s32.totalorder %s17_s10, %s17_s10 }
   0x6   :  { %p204_p2 = scmp.lt.s32.totalorder %s202_s14, %s198_s13 }
   0x8   :  { %p205_p3 = por %p204_p2, %p203_p1 }
   0xa   :  { %p206_p4 = pnand %p205_p3, %p199_p0 }
   0xc   :  { %209 = shalt.err (!%p206_p4)
}
   0xd   :  { %19 = dma.hbm_to_vmem [thread:$0]  %s294_s0, 16, %s17_s10, [#allocation3]  }
   0xe   :  { %s218_s17 = scalar_lea.vmem %s26_s12, 256  ;;  %p223_p6 = scmp.lt.s32.totalorder %s26_s12, %s26_s12 }
   0xf   :  { %p219_p5 = scmp.ne.s32.totalorder %s26_s12, %s218_s17  ;;  %p224_p7 = scmp.lt.s32.totalorder %s218_s17, %s218_s17 }
  0x11   :  { %p225_p8 = por %p224_p7, %p223_p6 }
  0x13   :  { %p226_p9 = pnand %p225_p8, %p219_p5 }
  0x15   :  { %229 = shalt.err (!%p226_p9)
}
  0x16   :  { %s258_s18 = smov 128   ;;  %s259_s19 = smov 8  }
  0x17   :  { %31 = dma.hbm_to_vmem [thread:$0]  %s295_s1, 256, %s26_s12, [#allocation6], %s258_s18, %s258_s18, %s259_s19  }
  0x18   :  { %250 = dma.done.wait [#allocation3], 16  }
  0x19   :  { %251 = vsyncadd [#allocation3], 4294967280 }
  0x1a   :  { %252 = dma.done.wait [#allocation6], 256  }
  0x1b   :  { %253 = vsyncadd [#allocation6], 4294967040  ;;  %v38_v0 = vlaneseq  ;;  %vm58_vm0 = vcmask 261120   ;;  %v160_v5 = vld [vmem:[#allocation2] ss:$0 sm:$0xff]  ;;  %v56_v6 = vld [vmem:[#allocation5] sm:$0xff] }
  0x1c   :  { %181 = vmatprep.mubr.msk.f32.mxu0 %vm58_vm0, %v56_v6  ;;  %v260_v7 = vmov 1.0   ;;  %v57_v8 = vld [vmem:[#allocation5 + $0x8] sm:$0xff]  ;;  %s261_s0 = smov [#allocation7]  }
  0x1d   :  { %v39_v1 = vshrl.u32 %v38_v0, 7  ;;  %s147_s1 = sshll.u32 %s261_s0, 4  ;;  %s148_s1 = int_to_ptr.vmem [resolvable:$true] %s147_s1 }
  0x1e   :  { %s230_s22 = scalar_lea.vmem %s148_s1, 256  ;;  %p235_p11 = scmp.lt.s32.totalorder %s148_s1, %s148_s1 }
  0x1f   :  { %v42_v2 = vadd.s32 24, %v39_v1  ;;  %v41_v3 = vadd.s32 16, %v39_v1  ;;  %v40_v4 = vadd.s32 8, %v39_v1  ;;  %vm48_vm4 = vcmp.eq.s32.totalorder %v39_v1, %v160_v5  ;;  %p231_p10 = scmp.ne.s32.totalorder %s148_s1, %s230_s22  ;;  %p236_p12 = scmp.lt.s32.totalorder %s230_s22, %s230_s22 }
  0x21   :  { %vm51_vm1 = vcmp.eq.s32.totalorder %v42_v2, %v160_v5  ;;  %vm50_vm2 = vcmp.eq.s32.totalorder %v41_v3, %v160_v5  ;;  %vm49_vm3 = vcmp.eq.s32.totalorder %v40_v4, %v160_v5  ;;  %p237_p13 = por %p236_p12, %p235_p11 }
  0x22   :  { %173 = vmatprep.subr.msk.mxu0 %vm51_vm1, %v260_v7 }
  0x23   :  { %174 = vmatpush3.msk.msra.mxu0 %vm51_vm1, %v260_v7  ;;  %p238_p0 = pnand %p237_p13, %p231_p10 }
  0x24   :  { %175 = vmatprep.subr.msk.mxu0 %vm50_vm2, %v260_v7 }
  0x25   :  { %176 = vmatpush3.msk.msra.mxu0 %vm50_vm2, %v260_v7 }
  0x26   :  { %177 = vmatprep.subr.msk.mxu0 %vm49_vm3, %v260_v7 }
  0x27   :  { %178 = vmatpush3.msk.msra.mxu0 %vm49_vm3, %v260_v7 }
  0x28   :  { %179 = vmatprep.subr.msk.mxu0 %vm48_vm4, %v260_v7 }
  0x29   :  { %180 = vmatpush3.msk.msra.mxu0 %vm48_vm4, %v260_v7 }
  0x2a   :  { %182 = vmatmul.mubr.msk.f32.vlgmr.msra.gmra.mxu0 %vm58_vm0, %v57_v8 }
  0xea   :  { %v183_v9 = vpop.f32.mrf.mxu0 }
  0xeb   :  { %141 = vst [vmem:[#allocation7 + $0x8] sm:$0xff] %v183_v9 }
  0xec   :  { %v131_v10 = vpop.f32.mrf.mxu0 }
  0xed   :  { %140 = vst [vmem:[#allocation7] sm:$0xff] %v131_v10 }
  0xee   :  { %241 = shalt.err (!%p238_p0)
}
  0xef   :  { %153 = dma.vmem_to_hbm [thread:$0]  %s148_s1, 256, %s296_s2, [#allocation4], %s258_s18, %s258_s18, %s259_s19  }
  0xf0   :  { %254 = dma.done.wait [#allocation4], 256  }
  0xf1   :  { %255 = vsyncadd [#allocation4], 4294967040 }
  0xf2   :  { %157 = vsyncpa [#allocation3], 1 }
  0xf3   :  { %158 = vsyncpa [#allocation6], 1 }
  0xf4   :  { %159 = vsyncpa [#allocation4], 1 }

</bundles_post_ra>
